<compile_context>
chip_gen: v7x
topology: tpu7x:2x2x1
jax: 0.10.0
libtpu: 0.0.40
codegen_flags: <defaults>
</compile_context>

<pallas_src>
import functools

import jax
import jax.numpy as jnp
from jax import lax
from jax.experimental import pallas as pl
from jax.experimental.pallas import tpu as pltpu

_LANE = 128
_MIB = 1024 * 1024


# ----------------------------------------------------------------------------
# Hardware-generation helpers
# ----------------------------------------------------------------------------
def _device_kind() -> str:
    try:
        return jax.devices()[0].device_kind.lower()
    except Exception:
        return ""


def _is_v7x(kind: str) -> bool:
    return ("v7" in kind) or ("7x" in kind)


def _vmem_capacity_bytes() -> int:
    try:
        info = pltpu.get_tpu_info()
        cap = getattr(info, "vmem_capacity_bytes", None)
        if cap:
            return int(cap)
    except Exception:
        pass
    kind = _device_kind()
    if _is_v7x(kind):
        return 64 * _MIB
    if ("v5" in kind) or ("v6" in kind):
        return 128 * _MIB
    return 64 * _MIB  # conservative default


def _vmem_budgets() -> tuple[int, int]:
    """(pipeline footprint budget, vmem_limit_bytes) for this generation."""
    if _vmem_capacity_bytes() <= 64 * _MIB:       # v7x-class
        return 40 * _MIB, 48 * _MIB
    return 88 * _MIB, 100 * _MIB                  # v5e / v6e (128 MiB VMEM)


def _min_grid_steps() -> int:
    # v7x: 2 TensorCores; keep >=4 pipeline steps per core after megacore split.
    return 8 if _is_v7x(_device_kind()) else 4


def _has_bf16_eup() -> bool:
    kind = _device_kind()
    return ("v6" in kind) or _is_v7x(kind)


# ----------------------------------------------------------------------------
# Single-pass kernel (full row extent per block, lane-tiled)
# ----------------------------------------------------------------------------
def _softmax_dim0_kernel(x_ref, o_ref, *, native_exp: bool):
    x = x_ref[...]
    if not native_exp:
        x = x.astype(jnp.float32)                 # f32 exp path (v5e / f32 inputs)
    x_exp = jnp.exp(x)                            # EUP transcendental
    sum_exp = jnp.sum(x_exp.astype(jnp.float32), axis=0, keepdims=True)  # f32 accum
    inv = pl.reciprocal(sum_exp, approx=True)     # EUP vrcp (free slot)
    o_ref[...] = (x_exp * inv).astype(o_ref.dtype)


def _choose_tile(m: int, n: int, itemsize: int, budget: int, min_grid: int):
    """Largest lane tile (multiple of 128) whose pipeline footprint fits the
    budget, preferring tiles that leave >= min_grid grid steps (pipelining +
    megacore), then >= 2 steps, then anything that fits. None if even
    (m, 128) does not fit (caller falls back to the two-pass path)."""
    n_up = pl.cdiv(n, _LANE) * _LANE
    best_full = best_pipe = best_any = None
    tn = _LANE
    while tn <= n_up:
        # 2 double-buffered DMA buffers (in + out) + f32 intermediates (x, x_exp).
        footprint = 4 * m * tn * itemsize + 2 * m * tn * 4
        if footprint <= budget:
            steps = pl.cdiv(n, tn)
            best_any = tn
            if steps >= 2:
                best_pipe = tn
            if steps >= min_grid:
                best_full = tn
        tn += _LANE
    return best_full or best_pipe or best_any


# ----------------------------------------------------------------------------
# Two-pass fallback for tall M (M-tiled, column sums accumulated across M)
# ----------------------------------------------------------------------------
def _colsum_kernel(x_ref, s_ref, *, m_total: int, tm: int):
    i = pl.program_id(1)  # M-block index (reduction axis, last in grid)

    @pl.when(i == 0)
    def _():
        s_ref[...] = jnp.zeros_like(s_ref)

    e = jnp.exp(x_ref[...].astype(jnp.float32))
    # Mask out-of-range rows of the ragged last M block (they would otherwise
    # pollute the column sums).
    rows = lax.broadcasted_iota(jnp.int32, e.shape, 0) + i * tm
    e = jnp.where(rows < m_total, e, 0.0)
    s_ref[...] += jnp.sum(e, axis=0, keepdims=True)


def _normalize_kernel(x_ref, s_ref, o_ref):
    e = jnp.exp(x_ref[...].astype(jnp.float32))
    inv = pl.reciprocal(s_ref[...], approx=True)
    o_ref[...] = (e * inv).astype(o_ref.dtype)


def _softmax_dim0_two_pass(x: jax.Array, tm: int, tn: int, vmem_limit: int):
    M, N = x.shape
    assert tm % 8 == 0 or tm == M, "tm must be a multiple of 8 or the full M"
    assert tn % _LANE == 0 or tn == N, "tn must be a multiple of 128 or the full N"
    grid = (pl.cdiv(N, tn), pl.cdiv(M, tm))

    sums = pl.pallas_call(
        functools.partial(_colsum_kernel, m_total=M, tm=tm),
        out_shape=jax.ShapeDtypeStruct((1, N), jnp.float32),
        grid_spec=pltpu.PrefetchScalarGridSpec(
            num_scalar_prefetch=0,
            grid=grid,
            in_specs=[pl.BlockSpec((tm, tn), lambda j, i: (i, j))],
            out_specs=pl.BlockSpec((1, tn), lambda j, i: (0, j)),
        ),
        compiler_params=pltpu.CompilerParams(
            dimension_semantics=("parallel", "arbitrary"),
            vmem_limit_bytes=vmem_limit,
        ),
    )(x)

    out = pl.pallas_call(
        _normalize_kernel,
        out_shape=jax.ShapeDtypeStruct((M, N), x.dtype),
        grid_spec=pltpu.PrefetchScalarGridSpec(
            num_scalar_prefetch=0,
            grid=grid,
            in_specs=[pl.BlockSpec((tm, tn), lambda j, i: (i, j)),
                      pl.BlockSpec((1, tn), lambda j, i: (0, j))],
            out_specs=pl.BlockSpec((tm, tn), lambda j, i: (i, j)),
        ),
        compiler_params=pltpu.CompilerParams(
            dimension_semantics=("parallel", "parallel"),
            vmem_limit_bytes=vmem_limit,
        ),
    )(x, sums)
    return out


# ----------------------------------------------------------------------------
# Public wrapper
# ----------------------------------------------------------------------------
def softmax_dim0(x: jax.Array, *, force_two_pass: bool = False,
                 two_pass_tiles: tuple[int, int] | None = None) -> jax.Array:
    """Naive softmax over axis 0 of a 2D array, matching the PyTorch module."""
    assert x.ndim == 2, "kernel implemented for 2D (seq, hidden) inputs"
    M, N = x.shape
    itemsize = jnp.dtype(x.dtype).itemsize
    budget, vmem_limit = _vmem_budgets()
    native_exp = (x.dtype == jnp.bfloat16) and _has_bf16_eup()

    tn = None
    if not force_two_pass:
        tn = _choose_tile(M, N, itemsize, budget, _min_grid_steps())

    if tn is None:
        # Tall-M fallback (or forced for testing): M-tiled two-pass path.
        if two_pass_tiles is not None:
            tm2, tn2 = two_pass_tiles
        else:
            tm2 = M if M <= 1024 else 1024
            tn2 = N if N <= 256 else 256
        return _softmax_dim0_two_pass(x, tm2, tn2, vmem_limit)

    tn = min(tn, N)                 # tn == N (full extent) or a multiple of 128
    grid = (pl.cdiv(N, tn),)        # no padding; ragged last block is clipped

    return pl.pallas_call(
        functools.partial(_softmax_dim0_kernel, native_exp=native_exp),
        out_shape=jax.ShapeDtypeStruct((M, N), x.dtype),
        grid_spec=pltpu.PrefetchScalarGridSpec(
            num_scalar_prefetch=0,
            grid=grid,
            in_specs=[pl.BlockSpec((M, tn), lambda j: (0, j))],
            out_specs=pl.BlockSpec((M, tn), lambda j: (0, j)),
        ),
        compiler_params=pltpu.CompilerParams(
            dimension_semantics=("parallel",),
            vmem_limit_bytes=vmem_limit,
        ),
    )(x)
    # TODO(synk): like the PyTorch module, this is the *naive* softmax (no
    # per-column max subtraction); inputs > ~88 in f32 will overflow exp.


if __name__ == "__main__":
    key = jax.random.PRNGKey(0)
    k1, k2, k3 = jax.random.split(key, 3)

    # Primary single-pass path: (seq=8, hidden=32), f32.
    x = jax.random.normal(k1, (8, 32), dtype=jnp.float32)
    out = jax.block_until_ready(softmax_dim0(x))
    x_exp = jnp.exp(x)
    ref = x_exp / jnp.sum(x_exp, axis=0, keepdims=True)
    assert out.shape == x.shape and out.dtype == x.dtype
    assert jnp.allclose(out, ref, atol=5e-3, rtol=5e-3), "single-pass mismatch"

    # Exercise the tall-M two-pass fallback with small forced tiles
    # (ragged last blocks on both the M and N axes).
    x2 = jax.random.normal(k2, (40, 160), dtype=jnp.float32)
    out2 = jax.block_until_ready(
        softmax_dim0(x2, force_two_pass=True, two_pass_tiles=(16, 128)))
    x2_exp = jnp.exp(x2)
    ref2 = x2_exp / jnp.sum(x2_exp, axis=0, keepdims=True)
    assert out2.shape == x2.shape and out2.dtype == x2.dtype
    assert jnp.allclose(out2, ref2, atol=5e-3, rtol=5e-3), "two-pass mismatch"

    # bf16 input (native bf16 exp on v6e/v7x, f32 exp path on v5e/unknown).
    x3 = jax.random.normal(k3, (8, 32), dtype=jnp.bfloat16)
    out3 = jax.block_until_ready(softmax_dim0(x3))
    x3f = x3.astype(jnp.float32)
    ref3 = jnp.exp(x3f) / jnp.sum(jnp.exp(x3f), axis=0, keepdims=True)
    assert out3.shape == x3.shape and out3.dtype == x3.dtype
    assert jnp.allclose(out3.astype(jnp.float32), ref3, atol=2e-2, rtol=2e-2), \
        "bf16 mismatch"

    print("KERNEL_OK")
</pallas_src>

<mosaic_0001>
module attributes {stable_mosaic.version = 11 : i64} {
  func.func @_softmax_dim0_kernel(%arg0: i32, %arg1: memref<8x32xf32, #tpu.memory_space<vmem>>, %arg2: memref<8x32xf32, #tpu.memory_space<vmem>>) attributes {dimension_semantics = [#tpu.dimension_semantics<parallel>], iteration_bounds = array<i64: 1>, scalar_prefetch = 0 : i64, scratch_operands = 0 : i64, tpu.core_type = #tpu.core_type<tc>, window_params = [{transform_indices = @transform_0, window_bounds = array<i64: 8, 32>}, {transform_indices = @transform_1, window_bounds = array<i64: 8, 32>}]} {
    %c0 = arith.constant 0 : index
    %c0_0 = arith.constant 0 : index
    %0 = vector.load %arg1[%c0, %c0_0] : memref<8x32xf32, #tpu.memory_space<vmem>>, vector<8x32xf32>
    %1 = math.exp %0 : vector<8x32xf32>
    %cst = arith.constant dense<0.000000e+00> : vector<32xf32>
    %2 = vector.multi_reduction <add>, %1, %cst [0] : vector<8x32xf32> to vector<32xf32>
    %3 = vector.shape_cast %2 : vector<32xf32> to vector<1x32xf32>
    %4 = tpu.reciprocal %3 {approx = true} : vector<1x32xf32> -> vector<1x32xf32>
    %5 = vector.broadcast %4 : vector<1x32xf32> to vector<8x32xf32>
    %6 = arith.mulf %1, %5 : vector<8x32xf32>
    %c0_1 = arith.constant 0 : index
    %c0_2 = arith.constant 0 : index
    %7 = vector.load %arg2[%c0_1, %c0_2] : memref<8x32xf32, #tpu.memory_space<vmem>>, vector<8x32xf32>
    tpu.vector_store %arg2[%c0_1, %c0_2], %6 {strides = array<i32>} : memref<8x32xf32, #tpu.memory_space<vmem>>, vector<8x32xf32>,
    return
  }
  func.func @transform_0(%arg0: i32) -> (i32, i32) {
    %c0_i32 = arith.constant 0 : i32
    %c0_i32_0 = arith.constant 0 : i32
    return %c0_i32, %arg0 : i32, i32
  }
  func.func @transform_1(%arg0: i32) -> (i32, i32) {
    %c0_i32 = arith.constant 0 : i32
    %c0_i32_0 = arith.constant 0 : i32
    return %c0_i32, %arg0 : i32, i32
  }
}

</mosaic_0001>

<bundles_post_ra>
// kernel: tpu_custom_call.1
= control target key start
LH: loop header
LB: loop body
LE: loop exit
PB: predicated region body
PF: predicated region fallthrough
CT: control target
= control target key end

     0   :  { %6 = vsyncpa [#allocation3], 0  ;;  %s140_s0 = inlined_call_operand.hbm [shape: f32[8,32], index: 0, kind: input, shape index: {}]   ;;  %s141_s1 = inlined_call_operand.hbm [shape: f32[8,32], index: 1, kind: output, shape index: {}]  }
   0x1   :  { %7 = vsyncpa [#allocation4], 0  ;;  %s104_s6 = smov [#allocation2]   ;;  %s56_s10 = scalar_lea.hbm %s140_s0, 128 }
   0x2   :  { %s14_s7 = sshll.u32 %s104_s6, 4  ;;  %p57_p0 = scmp.ne.s32.totalorder %s140_s0, %s56_s10  ;;  %s15_s7 = int_to_ptr.vmem [resolvable:$true] %s14_s7 }
   0x3   :  { %p60_p1 = scmp.lt.u32.totalorder %s56_s10, %s140_s0 }
   0x5   :  { %p62_p2 = pnand %p60_p1, %p57_p0 }
   0x7   :  { %65 = shalt.err (!%p62_p2)
}
   0x8   :  { %s66_s15 = scalar_lea.vmem %s15_s7, 128  ;;  %p71_p4 = scmp.lt.s32.totalorder %s15_s7, %s15_s7 }
   0x9   :  { %p67_p3 = scmp.ne.s32.totalorder %s15_s7, %s66_s15  ;;  %p72_p5 = scmp.lt.s32.totalorder %s66_s15, %s66_s15 }
   0xb   :  { %p73_p6 = por %p72_p5, %p71_p4 }
   0xd   :  { %p74_p7 = pnand %p73_p6, %p67_p3 }
   0xf   :  { %77 = shalt.err (!%p74_p7)
}
  0x10   :  { %17 = dma.hbm_to_vmem [thread:$0]  %s140_s0, 128, %s15_s7, [#allocation3]  }
  0x11   :  { %100 = dma.done.wait [#allocation3], 128  }
  0x12   :  { %101 = vsyncadd [#allocation3], 4294967168  ;;  %v21_v0 = vld [vmem:[#allocation2] sm:$0xff]  ;;  %vm24_vm0 = vcmask 261120   ;;  %s105_s18 = smov [#allocation5]  }
  0x13   :  { %v22_v1 = vmul.f32 1.442695, %v21_v0  ;;  %s41_s19 = sshll.u32 %s105_s18, 4  ;;  %s42_s19 = int_to_ptr.vmem [resolvable:$true] %s41_s19 }
  0x14   :  { %s78_s0 = scalar_lea.vmem %s42_s19, 128  ;;  %p83_p9 = scmp.lt.s32.totalorder %s42_s19, %s42_s19 }
  0x15   :  { %52 = vpow2.f32 %v22_v1  ;;  %p79_p8 = scmp.ne.s32.totalorder %s42_s19, %s78_s0  ;;  %p84_p10 = scmp.lt.s32.totalorder %s78_s0, %s78_s0 }
  0x17   :  { %p85_p11 = por %p84_p10, %p83_p9 }
  0x19   :  { %p86_p12 = pnand %p85_p11, %p79_p8 }
  0x1f   :  { %v53_v2 = vpop.eup %52 }
  0x20   :  { %v25_v3 = vsel %vm24_vm0, %v53_v2, 0.0 }
  0x21   :  { %v26_v4 = vrot.slane %v25_v3, 4 }
  0x23   :  { %v27_v5 = vadd.f32 %v26_v4, %v25_v3 }
  0x25   :  { %v28_v6 = vrot.slane %v27_v5, 2 }
  0x27   :  { %v29_v7 = vadd.f32 %v28_v6, %v27_v5 }
  0x29   :  { %v30_v8 = vrot.slane %v29_v7, 1 }
  0x2b   :  { %v31_v9 = vadd.f32 %v30_v8, %v29_v7 }
  0x2d   :  { %54 = vrcp.f32 %v31_v9 }
  0x37   :  { %v55_v10 = vpop.eup %54 }
  0x38   :  { %v33_v11 = vmul.f32 %v55_v10, %v53_v2 }
  0x3a   :  { %34 = vst.msk [vmem:[#allocation5] sm:$0xff] %vm24_vm0, %v33_v11 }
  0x3b   :  { %89 = shalt.err (!%p86_p12)
}
  0x3c   :  { %s90_s22 = scalar_lea.hbm %s141_s1, 128 }
  0x3d   :  { %p91_p13 = scmp.ne.s32.totalorder %s141_s1, %s90_s22  ;;  %p94_p0 = scmp.lt.u32.totalorder %s90_s22, %s141_s1 }
  0x3f   :  { %p96_p1 = pnand %p94_p0, %p91_p13 }
  0x41   :  { %99 = shalt.err (!%p96_p1)
}
  0x42   :  { %44 = dma.vmem_to_hbm [thread:$0]  %s42_s19, 128, %s141_s1, [#allocation4]  }
  0x43   :  { %102 = dma.done.wait [#allocation4], 128  }
  0x44   :  { %103 = vsyncadd [#allocation4], 4294967168 }
  0x45   :  { %48 = vsyncpa [#allocation3], 1 }
  0x46   :  { %49 = vsyncpa [#allocation4], 1 }

</bundles_post_ra>
